<compile_context>
chip_gen: v7x
topology: tpu7x:2x2x1
jax: 0.10.0
libtpu: 0.0.40
codegen_flags: <defaults>
</compile_context>

<pallas_src>
import functools

import jax
import jax.numpy as jnp
from jax.experimental import pallas as pl
from jax.experimental.pallas import tpu as pltpu


def rnn_fc_kernel(p_ref, whh_ref, wfc_ref, bfc_ref, out_ref, *, seq):
    # Load everything once; total footprint is a handful of vregs, so the projected
    # inputs P stay in registers (no scratch-VMEM round trip on the serial h chain).
    p = p_ref[...]            # (seq, rows, hidden), time-major, rows padded to 8
    whh = whh_ref[...]        # (hidden, hidden) = W_hh^T
    rows = p.shape[1]
    hidden = p.shape[2]

    h = jnp.zeros((rows, hidden), jnp.float32)
    # seq is a static Python int -> fully unrolled with static slices of the traced P.
    for t in range(seq):
        h = jnp.tanh(p[t] + jnp.dot(h, whh, preferred_element_type=jnp.float32))

    # Final Linear on the last hidden state; (rows, vocab) output is lane-dense (128).
    out_ref[...] = (jnp.dot(h, wfc_ref[...], preferred_element_type=jnp.float32)
                    + bfc_ref[...]).astype(out_ref.dtype)


@jax.jit
def simple_rnn_forward(question, emb_table, w_ih, w_hh, b_ih, b_hh, w_fc, b_fc):
    """question: (batch, seq) int32 token ids. Returns (batch, vocab) logits."""
    batch, seq = question.shape
    hidden = w_hh.shape[0]
    vocab = w_fc.shape[0]
    rows = max(8, ((batch + 7) // 8) * 8)          # pad batch rows to 8-sublane granule

    # Parameter-only precompute: project the whole embedding table through W_ih^T once
    # and fold both RNN biases.  (vocab, hidden) = 128x64 f32 -> 32 KB.
    table_proj = jnp.dot(emb_table.astype(jnp.float32), w_ih.T.astype(jnp.float32),
                         preferred_element_type=jnp.float32) + (b_ih + b_hh)

    # Per-token gather of projected rows, time-major, padded to `rows` per step.
    # TODO(synk): for very large vocab, move this gather in-kernel via scalar-prefetched ids.
    p = jnp.take(table_proj, question.T, axis=0)            # (seq, batch, hidden)
    p = jnp.pad(p, ((0, 0), (0, rows - batch), (0, 0)))     # (seq, rows, hidden)

    whh_t = w_hh.T.astype(jnp.float32)                      # (hidden, hidden)
    wfc_t = w_fc.T.astype(jnp.float32)                      # (hidden, vocab)
    bfc = b_fc.reshape(1, vocab).astype(jnp.float32)        # (1, vocab)

    flops = 2 * seq * rows * hidden * hidden + 2 * rows * hidden * vocab
    bytes_accessed = 4 * (p.size + whh_t.size + wfc_t.size + bfc.size + rows * vocab)
    cost = pl.CostEstimate(flops=flops,
                           transcendentals=seq * rows * hidden,
                           bytes_accessed=bytes_accessed)

    vmem = pltpu.MemorySpace.VMEM
    out = pl.pallas_call(
        functools.partial(rnn_fc_kernel, seq=seq),
        out_shape=jax.ShapeDtypeStruct((rows, vocab), jnp.float32),
        # Single invocation, no grid: whole problem (< 0.2 MiB) is VMEM-resident.
        in_specs=[
            pl.BlockSpec(memory_space=vmem),   # P      (seq, rows, hidden)
            pl.BlockSpec(memory_space=vmem),   # W_hh^T (hidden, hidden)
            pl.BlockSpec(memory_space=vmem),   # W_fc^T (hidden, vocab)
            pl.BlockSpec(memory_space=vmem),   # b_fc   (1, vocab)
        ],
        out_specs=pl.BlockSpec(memory_space=vmem),
        cost_estimate=cost,
    )(p, whh_t, wfc_t, bfc)

    return out[:batch]                                       # drop sublane padding rows


def reference_forward(question, emb_table, w_ih, w_hh, b_ih, b_hh, w_fc, b_fc):
    embedded = jnp.take(emb_table, question, axis=0)         # (batch, seq, emb)
    batch = question.shape[0]
    hidden = w_hh.shape[0]
    h = jnp.zeros((batch, hidden), jnp.float32)
    for t in range(question.shape[1]):
        x_t = embedded[:, t, :]
        h = jnp.tanh(x_t @ w_ih.T + b_ih + h @ w_hh.T + b_hh)
    return h @ w_fc.T + b_fc


if __name__ == "__main__":
    vocab_size = 128
    embedding_dim = 50
    hidden_size = 64
    batch = 2
    seq = 8

    key = jax.random.PRNGKey(0)
    k_emb, k_wih, k_whh, k_bih, k_bhh, k_wfc, k_bfc, k_q = jax.random.split(key, 8)

    # Deterministic synthetic parameters (shapes match nn.Embedding / nn.RNN / nn.Linear).
    emb_table = jax.random.normal(k_emb, (vocab_size, embedding_dim), jnp.float32) * 0.1
    w_ih = jax.random.normal(k_wih, (hidden_size, embedding_dim), jnp.float32) * 0.1
    w_hh = jax.random.normal(k_whh, (hidden_size, hidden_size), jnp.float32) * 0.1
    b_ih = jax.random.normal(k_bih, (hidden_size,), jnp.float32) * 0.1
    b_hh = jax.random.normal(k_bhh, (hidden_size,), jnp.float32) * 0.1
    w_fc = jax.random.normal(k_wfc, (vocab_size, hidden_size), jnp.float32) * 0.1
    b_fc = jax.random.normal(k_bfc, (vocab_size,), jnp.float32) * 0.1

    question = jax.random.randint(k_q, (batch, seq), 0, vocab_size, jnp.int32)

    out = simple_rnn_forward(question, emb_table, w_ih, w_hh, b_ih, b_hh, w_fc, b_fc)
    out = jax.block_until_ready(out)

    ref = reference_forward(question, emb_table, w_ih, w_hh, b_ih, b_hh, w_fc, b_fc)
    assert out.shape == (batch, vocab_size)
    assert jnp.allclose(out, ref, atol=1e-4, rtol=1e-4), "mismatch vs. JAX reference"

    print("KERNEL_OK")
</pallas_src>

<mosaic_0001>
module attributes {stable_mosaic.version = 11 : i64} {
  func.func @rnn_fc_kernel(%arg0: memref<8x8x64xf32, #tpu.memory_space<vmem>>, %arg1: memref<64x64xf32, #tpu.memory_space<vmem>>, %arg2: memref<64x128xf32, #tpu.memory_space<vmem>>, %arg3: memref<1x128xf32, #tpu.memory_space<vmem>>, %arg4: memref<8x128xf32, #tpu.memory_space<vmem>>) attributes {dimension_semantics = [], scalar_prefetch = 0 : i64, scratch_operands = 0 : i64, tpu.core_type = #tpu.core_type<tc>} {
    %c0 = arith.constant 0 : index
    %c0_0 = arith.constant 0 : index
    %c0_1 = arith.constant 0 : index
    %0 = vector.load %arg0[%c0, %c0_0, %c0_1] : memref<8x8x64xf32, #tpu.memory_space<vmem>>, vector<8x8x64xf32>
    %c0_2 = arith.constant 0 : index
    %c0_3 = arith.constant 0 : index
    %1 = vector.load %arg1[%c0_2, %c0_3] : memref<64x64xf32, #tpu.memory_space<vmem>>, vector<64x64xf32>
    %cst = arith.constant 0.000000e+00 : f32
    %2 = vector.broadcast %cst : f32 to vector<8x64xf32>
    %3 = vector.extract_strided_slice %0 {offsets = [0, 0, 0], sizes = [1, 8, 64], strides = [1, 1, 1]} : vector<8x8x64xf32> to vector<1x8x64xf32>
    %4 = vector.shape_cast %3 : vector<1x8x64xf32> to vector<8x64xf32>
    %cst_4 = arith.constant dense<0.000000e+00> : vector<8x64xf32>
    %5 = tpu.matmul %2, %1, %cst_4 {dimension_numbers = #tpu.dot_dimension_numbers<[1], [0], [0], [1], [0, 0, 1, 1], [], []>} : vector<8x64xf32>, vector<64x64xf32>, vector<8x64xf32> -> vector<8x64xf32>
    %6 = arith.addf %4, %5 : vector<8x64xf32>
    %7 = math.tanh %6 : vector<8x64xf32>
    %8 = vector.extract_strided_slice %0 {offsets = [1, 0, 0], sizes = [1, 8, 64], strides = [1, 1, 1]} : vector<8x8x64xf32> to vector<1x8x64xf32>
    %9 = vector.shape_cast %8 : vector<1x8x64xf32> to vector<8x64xf32>
    %cst_5 = arith.constant dense<0.000000e+00> : vector<8x64xf32>
    %10 = tpu.matmul %7, %1, %cst_5 {dimension_numbers = #tpu.dot_dimension_numbers<[1], [0], [0], [1], [0, 0, 1, 1], [], []>} : vector<8x64xf32>, vector<64x64xf32>, vector<8x64xf32> -> vector<8x64xf32>
    %11 = arith.addf %9, %10 : vector<8x64xf32>
    %12 = math.tanh %11 : vector<8x64xf32>
    %13 = vector.extract_strided_slice %0 {offsets = [2, 0, 0], sizes = [1, 8, 64], strides = [1, 1, 1]} : vector<8x8x64xf32> to vector<1x8x64xf32>
    %14 = vector.shape_cast %13 : vector<1x8x64xf32> to vector<8x64xf32>
    %cst_6 = arith.constant dense<0.000000e+00> : vector<8x64xf32>
    %15 = tpu.matmul %12, %1, %cst_6 {dimension_numbers = #tpu.dot_dimension_numbers<[1], [0], [0], [1], [0, 0, 1, 1], [], []>} : vector<8x64xf32>, vector<64x64xf32>, vector<8x64xf32> -> vector<8x64xf32>
    %16 = arith.addf %14, %15 : vector<8x64xf32>
    %17 = math.tanh %16 : vector<8x64xf32>
    %18 = vector.extract_strided_slice %0 {offsets = [3, 0, 0], sizes = [1, 8, 64], strides = [1, 1, 1]} : vector<8x8x64xf32> to vector<1x8x64xf32>
    %19 = vector.shape_cast %18 : vector<1x8x64xf32> to vector<8x64xf32>
    %cst_7 = arith.constant dense<0.000000e+00> : vector<8x64xf32>
    %20 = tpu.matmul %17, %1, %cst_7 {dimension_numbers = #tpu.dot_dimension_numbers<[1], [0], [0], [1], [0, 0, 1, 1], [], []>} : vector<8x64xf32>, vector<64x64xf32>, vector<8x64xf32> -> vector<8x64xf32>
    %21 = arith.addf %19, %20 : vector<8x64xf32>
    %22 = math.tanh %21 : vector<8x64xf32>
    %23 = vector.extract_strided_slice %0 {offsets = [4, 0, 0], sizes = [1, 8, 64], strides = [1, 1, 1]} : vector<8x8x64xf32> to vector<1x8x64xf32>
    %24 = vector.shape_cast %23 : vector<1x8x64xf32> to vector<8x64xf32>
    %cst_8 = arith.constant dense<0.000000e+00> : vector<8x64xf32>
    %25 = tpu.matmul %22, %1, %cst_8 {dimension_numbers = #tpu.dot_dimension_numbers<[1], [0], [0], [1], [0, 0, 1, 1], [], []>} : vector<8x64xf32>, vector<64x64xf32>, vector<8x64xf32> -> vector<8x64xf32>
    %26 = arith.addf %24, %25 : vector<8x64xf32>
    %27 = math.tanh %26 : vector<8x64xf32>
    %28 = vector.extract_strided_slice %0 {offsets = [5, 0, 0], sizes = [1, 8, 64], strides = [1, 1, 1]} : vector<8x8x64xf32> to vector<1x8x64xf32>
    %29 = vector.shape_cast %28 : vector<1x8x64xf32> to vector<8x64xf32>
    %cst_9 = arith.constant dense<0.000000e+00> : vector<8x64xf32>
    %30 = tpu.matmul %27, %1, %cst_9 {dimension_numbers = #tpu.dot_dimension_numbers<[1], [0], [0], [1], [0, 0, 1, 1], [], []>} : vector<8x64xf32>, vector<64x64xf32>, vector<8x64xf32> -> vector<8x64xf32>
    %31 = arith.addf %29, %30 : vector<8x64xf32>
    %32 = math.tanh %31 : vector<8x64xf32>
    %33 = vector.extract_strided_slice %0 {offsets = [6, 0, 0], sizes = [1, 8, 64], strides = [1, 1, 1]} : vector<8x8x64xf32> to vector<1x8x64xf32>
    %34 = vector.shape_cast %33 : vector<1x8x64xf32> to vector<8x64xf32>
    %cst_10 = arith.constant dense<0.000000e+00> : vector<8x64xf32>
    %35 = tpu.matmul %32, %1, %cst_10 {dimension_numbers = #tpu.dot_dimension_numbers<[1], [0], [0], [1], [0, 0, 1, 1], [], []>} : vector<8x64xf32>, vector<64x64xf32>, vector<8x64xf32> -> vector<8x64xf32>
    %36 = arith.addf %34, %35 : vector<8x64xf32>
    %37 = math.tanh %36 : vector<8x64xf32>
    %38 = vector.extract_strided_slice %0 {offsets = [7, 0, 0], sizes = [1, 8, 64], strides = [1, 1, 1]} : vector<8x8x64xf32> to vector<1x8x64xf32>
    %39 = vector.shape_cast %38 : vector<1x8x64xf32> to vector<8x64xf32>
    %cst_11 = arith.constant dense<0.000000e+00> : vector<8x64xf32>
    %40 = tpu.matmul %37, %1, %cst_11 {dimension_numbers = #tpu.dot_dimension_numbers<[1], [0], [0], [1], [0, 0, 1, 1], [], []>} : vector<8x64xf32>, vector<64x64xf32>, vector<8x64xf32> -> vector<8x64xf32>
    %41 = arith.addf %39, %40 : vector<8x64xf32>
    %42 = math.tanh %41 : vector<8x64xf32>
    %c0_12 = arith.constant 0 : index
    %c0_13 = arith.constant 0 : index
    %43 = vector.load %arg2[%c0_12, %c0_13] : memref<64x128xf32, #tpu.memory_space<vmem>>, vector<64x128xf32>
    %cst_14 = arith.constant dense<0.000000e+00> : vector<8x128xf32>
    %44 = tpu.matmul %42, %43, %cst_14 {dimension_numbers = #tpu.dot_dimension_numbers<[1], [0], [0], [1], [0, 0, 1, 1], [], []>} : vector<8x64xf32>, vector<64x128xf32>, vector<8x128xf32> -> vector<8x128xf32>
    %c0_15 = arith.constant 0 : index
    %c0_16 = arith.constant 0 : index
    %45 = vector.load %arg3[%c0_15, %c0_16] : memref<1x128xf32, #tpu.memory_space<vmem>>, vector<1x128xf32>
    %46 = vector.broadcast %45 : vector<1x128xf32> to vector<8x128xf32>
    %47 = arith.addf %44, %46 : vector<8x128xf32>
    %c0_17 = arith.constant 0 : index
    %c0_18 = arith.constant 0 : index
    %48 = vector.load %arg4[%c0_17, %c0_18] : memref<8x128xf32, #tpu.memory_space<vmem>>, vector<8x128xf32>
    tpu.vector_store %arg4[%c0_17, %c0_18], %47 {strides = array<i32>} : memref<8x128xf32, #tpu.memory_space<vmem>>, vector<8x128xf32>,
    return
  }
}

</mosaic_0001>

<bundles_post_ra>
// kernel: simple_rnn_forward.1
= control target key start
LH: loop header
LB: loop body
LE: loop exit
PB: predicated region body
PF: predicated region fallthrough
CT: control target
= control target key end

     0   :  { %v1115_v0 = vmov 0.0|0.0   ;;  %vm1116_vm0 = vmmov 0   ;;  %v1117_v4 = vmov 0.0   ;;  %vm33_vm1 = vcmask 523264   ;;  %s1324_s1 = inlined_call_operand.vmem [shape: f32[64,64], index: 1, kind: input, shape index: {}]   ;;  %s1325_s0 = inlined_call_operand.vmem [shape: f32[8,8,64], index: 0, kind: input, shape index: {}]   ;;  %s1326_s2 = inlined_call_operand.vmem [shape: f32[64,128], index: 2, kind: input, shape index: {}]   ;;  %s1327_s3 = inlined_call_operand.vmem [shape: f32[1,128], index: 3, kind: input, shape index: {}]   ;;  %s1328_s4 = inlined_call_operand.vmem [shape: f32[8,128], index: 4, kind: output, shape index: {}]  }
   0x1   :  { %988 = vmatprep.subr.bf16.mxu0 %v1115_v0  ;;  %v25_v1 = vld [vmem:[%s1324_s1] sm:$0xff]  ;;  %v26_v2 = vld [vmem:[%s1324_s1 + $0x8] sm:$0xff]  ;;  %v27_v3 = vld [vmem:[%s1324_s1 + $0x10] sm:$0xff]  ;;  %833 = vmatprep.mubr.msk.f32.mxu0 %vm1116_vm0, %v1117_v4 }
   0x2   :  { %v1155_v5 = vpack.c.bf16 %v26_v2, %v25_v1  ;;  %v28_v6 = vld [vmem:[%s1324_s1 + $0x18] sm:$0xff]  ;;  %1000 = vmatprep.subr.bf16.mxu1 %v1115_v0  ;;  %852 = vmatprep.mubr.msk.f32.mxu1 %vm1116_vm0, %v1117_v4  ;;  %v29_v8 = vld [vmem:[%s1324_s1 + $0x20] sm:$0xff]  ;;  %v30_v9 = vld [vmem:[%s1324_s1 + $0x28] sm:$0xff] }
   0x3   :  { %v1164_v7 = vpack.c.bf16 %v28_v6, %v27_v3  ;;  %v1176_v10 = vpack.c.bf16 %v30_v9, %v29_v8  ;;  %v31_v11 = vld [vmem:[%s1324_s1 + $0x30] sm:$0xff]  ;;  %v32_v12 = vld [vmem:[%s1324_s1 + $0x38] sm:$0xff]  ;;  %v17_v14 = vld [vmem:[%s1325_s0] sm:$0xff] }
   0x4   :  { %990 = vmatpush3.bf16.msra.mxu0 %v1155_v5  ;;  %1002 = vmatpush3.bf16.msra.mxu1 %v1155_v5  ;;  %v1188_v13 = vpack.c.bf16 %v32_v12, %v31_v11  ;;  %v18_v19 = vld [vmem:[%s1325_s0 + $0x8] sm:$0xff]  ;;  %v19_v24 = vld [vmem:[%s1325_s0 + $0x10] sm:$0xff]  ;;  %v20_v29 = vld [vmem:[%s1325_s0 + $0x18] sm:$0xff] }
   0x5   :  { %991 = vmatprep.subr.bf16.mxu0 %v1115_v0  ;;  %1003 = vmatprep.subr.bf16.mxu1 %v1115_v0  ;;  %v21_v34 = vld [vmem:[%s1325_s0 + $0x20] sm:$0xff]  ;;  %v22_v39 = vld [vmem:[%s1325_s0 + $0x28] sm:$0xff]  ;;  %v23_v47 = vld [vmem:[%s1325_s0 + $0x30] sm:$0xff] }
   0x6   :  { %v634_v44 = vld [vmem:[%s1326_s2] sm:$0xff]  ;;  %v635_v45 = vld [vmem:[%s1326_s2 + $0x8] sm:$0xff]  ;;  %v636_v52 = vld [vmem:[%s1326_s2 + $0x10] sm:$0xff] }
   0x7   :  { %v1085_v46 = vpack.c.bf16 %v635_v45, %v634_v44  ;;  %v637_v53 = vld [vmem:[%s1326_s2 + $0x18] sm:$0xff]  ;;  %v638_v55 = vld [vmem:[%s1326_s2 + $0x20] sm:$0xff]  ;;  %v639_v56 = vld [vmem:[%s1326_s2 + $0x28] sm:$0xff] }
   0x8   :  { %993 = vmatpush3.bf16.msra.mxu0 %v1164_v7  ;;  %1005 = vmatpush3.bf16.msra.mxu1 %v1164_v7  ;;  %v1088_v54 = vpack.c.bf16 %v637_v53, %v636_v52  ;;  %v1091_v57 = vpack.c.bf16 %v639_v56, %v638_v55  ;;  %v640_v58 = vld [vmem:[%s1326_s2 + $0x30] sm:$0xff]  ;;  %v641_v59 = vld [vmem:[%s1326_s2 + $0x38] sm:$0xff]  ;;  %v734_v3 = vld [vmem:[%s1327_s3] ss:$0 sm:$0xff] }
   0x9   :  { %994 = vmatprep.subr.bf16.mxu0 %v1115_v0  ;;  %1006 = vmatprep.subr.bf16.mxu1 %v1115_v0  ;;  %v1094_v60 = vpack.c.bf16 %v641_v59, %v640_v58  ;;  %v24_v61 = vld [vmem:[%s1325_s0 + $0x38] sm:$0xff] }
   0xc   :  { %996 = vmatpush3.bf16.msra.mxu0 %v1176_v10  ;;  %1008 = vmatpush3.bf16.msra.mxu1 %v1176_v10 }
   0xd   :  { %997 = vmatprep.subr.bf16.mxu0 %v1115_v0  ;;  %1009 = vmatprep.subr.bf16.mxu1 %v1115_v0 }
  0x10   :  { %999 = vmatpush3.bf16.msra.mxu0 %v1188_v13  ;;  %1011 = vmatpush3.bf16.msra.mxu1 %v1188_v13 }
  0x11   :  { %1012 = vmatprep.subr.bf16.mxu0 %v1115_v0  ;;  %1024 = vmatprep.subr.bf16.mxu1 %v1115_v0 }
  0x13   :  { %834 = vmatmul.mubr.f32.vlgmr.msra.gmra.mrb[0].mxu0 %v1117_v4 }
  0x14   :  { %1014 = vmatpush3.bf16.msra.mxu0 %v1155_v5  ;;  %871 = vmatprep.mubr.msk.f32.mxu0 %vm1116_vm0, %v1117_v4 }
  0x15   :  { %1015 = vmatprep.subr.bf16.mxu0 %v1115_v0 }
  0x18   :  { %1017 = vmatpush3.bf16.msra.mxu0 %v1164_v7 }
  0x19   :  { %1018 = vmatprep.subr.bf16.mxu0 %v1115_v0 }
  0x1c   :  { %1020 = vmatpush3.bf16.msra.mxu0 %v1176_v10 }
  0x1d   :  { %1021 = vmatprep.subr.bf16.mxu0 %v1115_v0 }
  0x20   :  { %1023 = vmatpush3.bf16.msra.mxu0 %v1188_v13 }
  0x21   :  { %1036 = vmatprep.subr.bf16.mxu0 %v1115_v0 }
  0xe6   :  { %v103_v15 = vpop.f32.mrb[0].mxu0 }
  0xe7   :  { %v107_v16 = vadd.f32 %v103_v15, %v17_v14  ;;  %v835_v17 = vpop.f32.mrb[1].mxu0 }
  0xe9   :  { %1099 = vtanh.f32 %v107_v16 }
  0xf3   :  { %v1100_v18 = vpop.eup %1099 }
  0xf4   :  { %853 = vmatmul.mubr.msk.f32.vlgmr.msra.gmra.mrb[0].mxu1 %vm33_vm1, %v1100_v18 }
  0xf5   :  { %1026 = vmatpush3.bf16.msra.mxu1 %v1155_v5  ;;  %890 = vmatprep.mubr.msk.f32.mxu1 %vm1116_vm0, %v1117_v4 }
  0xf6   :  { %1027 = vmatprep.subr.bf16.mxu1 %v1115_v0 }
  0xf9   :  { %1029 = vmatpush3.bf16.msra.mxu1 %v1164_v7 }
  0xfa   :  { %1030 = vmatprep.subr.bf16.mxu1 %v1115_v0 }
  0xfd   :  { %1032 = vmatpush3.bf16.msra.mxu1 %v1176_v10 }
  0xfe   :  { %1033 = vmatprep.subr.bf16.mxu1 %v1115_v0 }
 0x101   :  { %1035 = vmatpush3.bf16.msra.mxu1 %v1188_v13 }
 0x102   :  { %1048 = vmatprep.subr.bf16.mxu1 %v1115_v0 }
 0x1c7   :  { %v178_v20 = vpop.f32.mrb[0].mxu1 }
 0x1c8   :  { %v182_v21 = vadd.f32 %v178_v20, %v18_v19  ;;  %v854_v22 = vpop.f32.mrb[1].mxu1 }
 0x1ca   :  { %1101 = vtanh.f32 %v182_v21 }
 0x1d4   :  { %v1102_v23 = vpop.eup %1101 }
 0x1d5   :  { %872 = vmatmul.mubr.msk.f32.vlgmr.msra.gmra.mrb[2].mxu0 %vm33_vm1, %v1102_v23 }
 0x1d6   :  { %1038 = vmatpush3.bf16.msra.mxu0 %v1155_v5  ;;  %909 = vmatprep.mubr.msk.f32.mxu0 %vm1116_vm0, %v1117_v4 }
 0x1d7   :  { %1039 = vmatprep.subr.bf16.mxu0 %v1115_v0 }
 0x1da   :  { %1041 = vmatpush3.bf16.msra.mxu0 %v1164_v7 }
 0x1db   :  { %1042 = vmatprep.subr.bf16.mxu0 %v1115_v0 }
 0x1de   :  { %1044 = vmatpush3.bf16.msra.mxu0 %v1176_v10 }
 0x1df   :  { %1045 = vmatprep.subr.bf16.mxu0 %v1115_v0 }
 0x1e2   :  { %1047 = vmatpush3.bf16.msra.mxu0 %v1188_v13 }
 0x1e3   :  { %1060 = vmatprep.subr.bf16.mxu0 %v1115_v0 }
 0x2a8   :  { %v253_v25 = vpop.f32.mrb[2].mxu0 }
 0x2a9   :  { %v257_v26 = vadd.f32 %v253_v25, %v19_v24  ;;  %v873_v27 = vpop.f32.mrb[3].mxu0 }
 0x2ab   :  { %1103 = vtanh.f32 %v257_v26 }
 0x2b5   :  { %v1104_v28 = vpop.eup %1103 }
 0x2b6   :  { %891 = vmatmul.mubr.msk.f32.vlgmr.msra.gmra.mrb[2].mxu1 %vm33_vm1, %v1104_v28 }
 0x2b7   :  { %1050 = vmatpush3.bf16.msra.mxu1 %v1155_v5  ;;  %928 = vmatprep.mubr.msk.f32.mxu1 %vm1116_vm0, %v1117_v4 }
 0x2b8   :  { %1051 = vmatprep.subr.bf16.mxu1 %v1115_v0 }
 0x2bb   :  { %1053 = vmatpush3.bf16.msra.mxu1 %v1164_v7 }
 0x2bc   :  { %1054 = vmatprep.subr.bf16.mxu1 %v1115_v0 }
 0x2bf   :  { %1056 = vmatpush3.bf16.msra.mxu1 %v1176_v10 }
 0x2c0   :  { %1057 = vmatprep.subr.bf16.mxu1 %v1115_v0 }
 0x2c3   :  { %1059 = vmatpush3.bf16.msra.mxu1 %v1188_v13 }
 0x2c4   :  { %1072 = vmatprep.subr.bf16.mxu1 %v1115_v0 }
 0x389   :  { %v328_v30 = vpop.f32.mrb[2].mxu1 }
 0x38a   :  { %v332_v31 = vadd.f32 %v328_v30, %v20_v29  ;;  %v892_v32 = vpop.f32.mrb[3].mxu1 }
 0x38c   :  { %1105 = vtanh.f32 %v332_v31 }
 0x396   :  { %v1106_v33 = vpop.eup %1105 }
 0x397   :  { %910 = vmatmul.mubr.msk.f32.vlgmr.msra.gmra.mrb[4].mxu0 %vm33_vm1, %v1106_v33 }
 0x398   :  { %1062 = vmatpush3.bf16.msra.mxu0 %v1155_v5  ;;  %947 = vmatprep.mubr.msk.f32.mxu0 %vm1116_vm0, %v1117_v4 }
 0x399   :  { %1063 = vmatprep.subr.bf16.mxu0 %v1115_v0 }
 0x39c   :  { %1065 = vmatpush3.bf16.msra.mxu0 %v1164_v7 }
 0x39d   :  { %1066 = vmatprep.subr.bf16.mxu0 %v1115_v0 }
 0x3a0   :  { %1068 = vmatpush3.bf16.msra.mxu0 %v1176_v10 }
 0x3a1   :  { %1069 = vmatprep.subr.bf16.mxu0 %v1115_v0 }
 0x3a4   :  { %1071 = vmatpush3.bf16.msra.mxu0 %v1188_v13 }
 0x3a5   :  { %1084 = vmatprep.subr.bf16.mxu0 %v1115_v0 }
 0x46a   :  { %v403_v35 = vpop.f32.mrb[4].mxu0 }
 0x46b   :  { %v407_v36 = vadd.f32 %v403_v35, %v21_v34  ;;  %v911_v37 = vpop.f32.mrb[5].mxu0 }
 0x46d   :  { %1107 = vtanh.f32 %v407_v36 }
 0x477   :  { %v1108_v38 = vpop.eup %1107 }
 0x478   :  { %929 = vmatmul.mubr.msk.f32.vlgmr.msra.gmra.mrb[4].mxu1 %vm33_vm1, %v1108_v38 }
 0x479   :  { %1074 = vmatpush3.bf16.msra.mxu1 %v1155_v5  ;;  %966 = vmatprep.mubr.msk.f32.mxu1 %vm1116_vm0, %v1117_v4 }
 0x47a   :  { %1075 = vmatprep.subr.bf16.mxu1 %v1115_v0 }
 0x47d   :  { %1077 = vmatpush3.bf16.msra.mxu1 %v1164_v7 }
 0x47e   :  { %1078 = vmatprep.subr.bf16.mxu1 %v1115_v0 }
 0x481   :  { %1080 = vmatpush3.bf16.msra.mxu1 %v1176_v10 }
 0x482   :  { %1081 = vmatprep.subr.bf16.mxu1 %v1115_v0 }
 0x485   :  { %1083 = vmatpush3.bf16.msra.mxu1 %v1188_v13 }
 0x54b   :  { %v478_v40 = vpop.f32.mrb[4].mxu1 }
 0x54c   :  { %v482_v41 = vadd.f32 %v478_v40, %v22_v39  ;;  %v930_v42 = vpop.f32.mrb[5].mxu1 }
 0x54e   :  { %1109 = vtanh.f32 %v482_v41 }
 0x558   :  { %v1110_v43 = vpop.eup %1109 }
 0x559   :  { %948 = vmatmul.mubr.msk.f32.vlgmr.msra.gmra.mrb[6].mxu0 %vm33_vm1, %v1110_v43 }
 0x55a   :  { %985 = vmatprep.mubr.msk.f32.mxu0 %vm1116_vm0, %v1117_v4  ;;  %1086 = vmatpush3.bf16.msra.mxu0 %v1085_v46 }
 0x55b   :  { %1087 = vmatprep.subr.bf16.mxu0 %v1115_v0 }
 0x55e   :  { %1089 = vmatpush3.bf16.msra.mxu0 %v1088_v54 }
 0x55f   :  { %1090 = vmatprep.subr.bf16.mxu0 %v1115_v0 }
 0x562   :  { %1092 = vmatpush3.bf16.msra.mxu0 %v1091_v57 }
 0x563   :  { %1093 = vmatprep.subr.bf16.mxu0 %v1115_v0 }
 0x566   :  { %1095 = vmatpush3.bf16.msra.mxu0 %v1094_v60 }
 0x62c   :  { %v553_v48 = vpop.f32.mrb[6].mxu0 }
 0x62d   :  { %v557_v49 = vadd.f32 %v553_v48, %v23_v47  ;;  %v949_v50 = vpop.f32.mrb[7].mxu0 }
 0x62f   :  { %1111 = vtanh.f32 %v557_v49 }
 0x639   :  { %v1112_v51 = vpop.eup %1111 }
 0x63a   :  { %967 = vmatmul.mubr.msk.f32.vlgmr.msra.gmra.mrb[6].mxu1 %vm33_vm1, %v1112_v51 }
 0x70d   :  { %v628_v62 = vpop.f32.mrb[6].mxu1 }
 0x70e   :  { %v632_v63 = vadd.f32 %v628_v62, %v24_v61  ;;  %v968_v1 = vpop.f32.mrb[7].mxu1 }
 0x710   :  { %1113 = vtanh.f32 %v632_v63 }
 0x71a   :  { %v1114_v2 = vpop.eup %1113 }
 0x71b   :  { %986 = vmatmul.mubr.msk.f32.vlgmr.msra.gmra.mrb[8].mxu0 %vm33_vm1, %v1114_v2 }
 0x7ee   :  { %v718_v4 = vpop.f32.mrb[8].mxu0 }
 0x7ef   :  { %v719_v5 = vadd.f32 %v734_v3, %v718_v4  ;;  %v987_v6 = vpop.f32.mrb[9].mxu0 }
 0x7f1   :  { %722 = vst [vmem:[%s1328_s4] sm:$0xff] %v719_v5 }

</bundles_post_ra>
